<compile_context>
chip_gen: v7x
topology: tpu7x:2x2x1
jax: 0.10.0
libtpu: 0.0.40
codegen_flags: <defaults>
</compile_context>

<pallas_src>
import jax
import jax.numpy as jnp
from jax.experimental import pallas as pl
from jax.experimental.pallas import tpu as pltpu

_EPS = 1e-5
_LANE = 128


def _round_up(n, m):
    return ((n + m - 1) // m) * m


def _make_kernel(taps, res_off, has_proj):
    """taps: three static (L_offset, C_offset) pairs into the packed input `xr`.
    res_off: (L_offset, C_offset) of the (already strided) residual view of x.
    has_proj: residual is a 1x1 conv projection (fused into tap 1), else identity."""

    def kernel(*refs):
        if has_proj:
            (x_ref, w1a_ref, w1res_ref, g1_ref, be1_ref,
             w2_ref, g2_ref, be2_ref, bres_ref, out_ref, hpad_ref) = refs
        else:
            (x_ref, w1_ref, g1_ref, be1_ref,
             w2_ref, g2_ref, be2_ref, out_ref, hpad_ref) = refs

        N, Lo, Cmed = out_ref.shape
        rows = N * Lo

        def bn_relu(h, g_ref, b_ref):
            # training-mode BatchNorm1d (biased batch stats per channel), folded to
            # a single affine on the centered activations; rsqrt on the EUP.
            mu = jnp.mean(h, axis=0, keepdims=True)
            hc = h - mu
            var = jnp.mean(hc * hc, axis=0, keepdims=True)
            scale = g_ref[...] * jax.lax.rsqrt(var + _EPS)
            return jnp.maximum(hc * scale + b_ref[...], 0.0)

        def tap(lo, co, cin):
            xk = x_ref[:, lo:lo + Lo, co:co + cin].reshape(rows, cin)
            return xk.astype(jnp.bfloat16)  # no-op when x already bf16

        # ---- conv1 (stride folded into taps); conv bias absorbed by BN mean ----
        if has_proj:
            Cin = w1a_ref.shape[1]
            # tap 1 fused with the 1x1 residual projection: (rows, Cin) x (Cin, 2*Cmed)
            t1 = jnp.dot(tap(*taps[1], Cin), w1res_ref[...],
                         preferred_element_type=jnp.float32)
            h = (jnp.dot(tap(*taps[0], Cin), w1a_ref[0],
                         preferred_element_type=jnp.float32)
                 + t1[:, :Cmed]
                 + jnp.dot(tap(*taps[2], Cin), w1a_ref[1],
                           preferred_element_type=jnp.float32))
            res = t1[:, Cmed:] + bres_ref[...]
        else:
            Cin = w1_ref.shape[1]
            h = None
            for k, (lo, co) in enumerate(taps):
                t = jnp.dot(tap(lo, co, Cin), w1_ref[k],
                            preferred_element_type=jnp.float32)
                h = t if h is None else h + t
            lo, co = res_off
            # identity residual: exact f32 add (Cin == Cmed), no projection matmul
            res = x_ref[:, lo:lo + Lo, co:co + Cin].reshape(rows, Cin)

        h = bn_relu(h, g1_ref, be1_ref)

        # ---- conv2 (k=3, stride=1, pad=1): bf16 halo scratch, cast once on store;
        #      middle tap uses the live h value, only the 2 halo rows are zeroed. ----
        h_bf = h.astype(jnp.bfloat16)
        zero_row = jnp.zeros((N, 1, Cmed), hpad_ref.dtype)
        hpad_ref[:, 0:1, :] = zero_row
        hpad_ref[:, Lo + 1:Lo + 2, :] = zero_row
        hpad_ref[:, 1:Lo + 1, :] = h_bf.reshape(N, Lo, Cmed)

        acc = jnp.dot(h_bf, w2_ref[1], preferred_element_type=jnp.float32)
        for k in (0, 2):
            hk = hpad_ref[:, k:k + Lo, :].reshape(rows, Cmed)
            acc = acc + jnp.dot(hk, w2_ref[k], preferred_element_type=jnp.float32)
        y = bn_relu(acc, g2_ref, be2_ref)

        out_ref[...] = (y + res).reshape(N, Lo, Cmed)

    return kernel


def bottlrneck_forward(x_ncl, params, in_ch, med_ch, downsample=False):
    """x_ncl: (N, C_in, L) float32 (PyTorch NCL). Returns (N, C_med, L_out)."""
    stride = 2 if downsample else 1
    N, C, L = x_ncl.shape
    assert C == in_ch
    has_proj = params['wres'] is not None
    if not has_proj:
        # PyTorch's identity residual with downsample would shape-error in the
        # reference module itself; keep the same constraint explicit here.
        assert stride == 1, "identity residual requires stride == 1"
    L_out = (L + 2 - 3) // stride + 1

    Cp_in = _round_up(in_ch, _LANE)
    Cp_med = _round_up(med_ch, _LANE)

    # channels-last + lane-dense channel padding; bf16 when x only feeds matmuls
    x_dtype = jnp.bfloat16 if has_proj else jnp.float32
    x_nlc = jnp.transpose(x_ncl, (0, 2, 1)).astype(x_dtype)
    x_nlc = jnp.pad(x_nlc, ((0, 0), (0, 0), (0, Cp_in - in_ch)))
    x_pad = jnp.pad(x_nlc, ((0, 0), (1, 1), (0, 0)))            # conv zero-pad along L

    # Pack x so the kernel only needs *contiguous* shifted slices for the conv taps
    # and the (strided) residual — no im2col, no in-kernel strided loads.
    if stride == 1:
        xr = x_pad                                              # (N, L+2, Cp_in)
        taps = ((0, 0), (1, 0), (2, 0))
        res_off = (1, 0)
    else:
        Lp = x_pad.shape[1]
        if Lp % 2:
            x_pad = jnp.pad(x_pad, ((0, 0), (0, 1), (0, 0)))
            Lp += 1
        # (N, Lp, Cp) -> (N, Lp/2, 2*Cp): even L-positions in lanes [0,Cp),
        # odd L-positions in lanes [Cp,2Cp); both 128-aligned.
        xr = x_pad.reshape(N, Lp // 2, 2 * Cp_in)
        taps = ((0, 0), (0, Cp_in), (1, 0))
        res_off = (0, Cp_in)

    # weights: torch (O, I, K) -> per-tap (K, I, O), channel padded, bf16
    def prep_w3(w, ci, co):
        wk = jnp.transpose(w, (2, 1, 0)).astype(jnp.float32)
        wk = jnp.pad(wk, ((0, 0), (0, ci - wk.shape[1]), (0, co - wk.shape[2])))
        return wk.astype(jnp.bfloat16)

    def prep_vec(v):
        return jnp.pad(v.astype(jnp.float32),
                       (0, Cp_med - v.shape[0])).reshape(1, Cp_med)

    w1 = prep_w3(params['w1'], Cp_in, Cp_med)                   # (3, Cp_in, Cp_med)
    w2 = prep_w3(params['w2'], Cp_med, Cp_med)                  # (3, Cp_med, Cp_med)

    if has_proj:
        wres = jnp.transpose(params['wres'][:, :, 0], (1, 0)).astype(jnp.float32)
        wres = jnp.pad(wres, ((0, Cp_in - in_ch), (0, Cp_med - med_ch)))
        w1res = jnp.concatenate([w1[1], wres.astype(jnp.bfloat16)], axis=1)
        w1a = jnp.stack([w1[0], w1[2]], axis=0)                 # taps 0 and 2 only
        inputs = [xr, w1a, w1res,
                  prep_vec(params['g1']), prep_vec(params['be1']),
                  w2, prep_vec(params['g2']), prep_vec(params['be2']),
                  prep_vec(params['bres'])]
    else:
        inputs = [xr, w1,
                  prep_vec(params['g1']), prep_vec(params['be1']),
                  w2, prep_vec(params['g2']), prep_vec(params['be2'])]

    vmem = pl.BlockSpec(memory_space=pltpu.MemorySpace.VMEM)
    out_bytes = N * L_out * Cp_med * 4
    scratch_bytes = N * (L_out + 2) * Cp_med * 2                # bf16 halo scratch
    in_bytes = sum(int(a.size) * int(a.dtype.itemsize) for a in inputs)
    try:
        phys = int(getattr(pltpu.get_tpu_info(), 'vmem_capacity_bytes', 128 << 20))
    except Exception:                                           # pragma: no cover
        phys = 128 << 20
    cap = (phys * 3) // 4                                       # ~48 MiB v7x, ~96 MiB v5e/v6e
    vmem_limit = int(min(max(2 * (in_bytes + out_bytes) + scratch_bytes + (4 << 20),
                             16 << 20), cap))

    out = pl.pallas_call(
        _make_kernel(taps, res_off, has_proj),
        out_shape=jax.ShapeDtypeStruct((N, L_out, Cp_med), jnp.float32),
        in_specs=[vmem] * len(inputs),
        out_specs=vmem,
        scratch_shapes=[pltpu.VMEM((N, L_out + 2, Cp_med), jnp.bfloat16)],
        compiler_params=pltpu.CompilerParams(vmem_limit_bytes=vmem_limit),
    )(*inputs)

    out = out[:, :, :med_ch]                                    # drop channel padding
    return jnp.transpose(out, (0, 2, 1))                        # back to (N, Cmed, Lout)


# ------------------------- deterministic parameters -------------------------
def make_params(key, in_ch, med_ch):
    ks = jax.random.split(key, 10)
    p = {
        'w1': 0.3 * jax.random.normal(ks[0], (med_ch, in_ch, 3), jnp.float32),
        'b1': 0.1 * jax.random.normal(ks[1], (med_ch,), jnp.float32),
        'g1': 1.0 + 0.1 * jax.random.normal(ks[2], (med_ch,), jnp.float32),
        'be1': 0.1 * jax.random.normal(ks[3], (med_ch,), jnp.float32),
        'w2': 0.3 * jax.random.normal(ks[4], (med_ch, med_ch, 3), jnp.float32),
        'b2': 0.1 * jax.random.normal(ks[5], (med_ch,), jnp.float32),
        'g2': 1.0 + 0.1 * jax.random.normal(ks[6], (med_ch,), jnp.float32),
        'be2': 0.1 * jax.random.normal(ks[7], (med_ch,), jnp.float32),
    }
    if in_ch != med_ch:
        p['wres'] = 0.3 * jax.random.normal(ks[8], (med_ch, in_ch, 1), jnp.float32)
        p['bres'] = 0.1 * jax.random.normal(ks[9], (med_ch,), jnp.float32)
    else:
        p['wres'] = None
        p['bres'] = None
    return p


# ----------------------------- pure-JAX reference ----------------------------
def _conv1d(x, w, b, stride, padding):
    out = jax.lax.conv_general_dilated(
        x, w, window_strides=(stride,), padding=[(padding, padding)],
        dimension_numbers=('NCH', 'OIH', 'NCH'))
    return out + b[None, :, None]


def _bn_train(x, gamma, beta):
    mu = jnp.mean(x, axis=(0, 2), keepdims=True)
    var = jnp.mean((x - mu) ** 2, axis=(0, 2), keepdims=True)
    return gamma[None, :, None] * (x - mu) * jax.lax.rsqrt(var + _EPS) + beta[None, :, None]


def ref_forward(x, p, downsample):
    stride = 2 if downsample else 1
    h = _conv1d(x, p['w1'], p['b1'], stride, 1)
    h = jnp.maximum(_bn_train(h, p['g1'], p['be1']), 0.0)
    h = _conv1d(h, p['w2'], p['b2'], 1, 1)
    h = jnp.maximum(_bn_train(h, p['g2'], p['be2']), 0.0)
    if p['wres'] is not None:
        res = _conv1d(x, p['wres'], p['bres'], stride, 0)
    else:
        res = x
    return h + res


if __name__ == "__main__":
    key = jax.random.PRNGKey(0)
    N, L = 2, 16
    # (in_ch, med_ch, downsample): projection residual, identity residual, strided block
    configs = [(4, 8, False), (8, 8, False), (4, 8, True)]
    kx, kp = jax.random.split(key)
    for in_ch, med_ch, ds in configs:
        kx, sx = jax.random.split(kx)
        kp, sp = jax.random.split(kp)
        x = jax.random.normal(sx, (N, in_ch, L), jnp.float32)
        params = make_params(sp, in_ch, med_ch)

        out = jax.block_until_ready(
            bottlrneck_forward(x, params, in_ch, med_ch, downsample=ds))
        ref = ref_forward(x, params, ds)

        assert out.shape == ref.shape, (out.shape, ref.shape)
        # bf16 MXU matmuls (and bf16 x in the projection case) vs. the all-f32
        # reference: tolerance is loosened accordingly; algorithmic errors would be
        # O(1), far above this.
        if not bool(jnp.allclose(out, ref, rtol=5e-2, atol=5e-2)):
            raise SystemExit(
                f"mismatch cfg={(in_ch, med_ch, ds)} "
                f"max_abs_err={float(jnp.max(jnp.abs(out - ref)))}")
    print("KERNEL_OK")
</pallas_src>

<mosaic_0001>
module attributes {stable_mosaic.version = 11 : i64} {
  func.func @kernel(%arg0: memref<2x18x128xbf16, #tpu.memory_space<vmem>>, %arg1: memref<2x128x128xbf16, #tpu.memory_space<vmem>>, %arg2: memref<128x256xbf16, #tpu.memory_space<vmem>>, %arg3: memref<1x128xf32, #tpu.memory_space<vmem>>, %arg4: memref<1x128xf32, #tpu.memory_space<vmem>>, %arg5: memref<3x128x128xbf16, #tpu.memory_space<vmem>>, %arg6: memref<1x128xf32, #tpu.memory_space<vmem>>, %arg7: memref<1x128xf32, #tpu.memory_space<vmem>>, %arg8: memref<1x128xf32, #tpu.memory_space<vmem>>, %arg9: memref<2x16x128xf32, #tpu.memory_space<vmem>>, %arg10: memref<2x18x128xbf16, #tpu.memory_space<vmem>>) attributes {dimension_semantics = [], scalar_prefetch = 0 : i64, scratch_operands = 1 : i64, tpu.core_type = #tpu.core_type<tc>} {
    %c0 = arith.constant 0 : index
    %c1 = arith.constant 1 : index
    %c0_0 = arith.constant 0 : index
    %0 = vector.load %arg0[%c0, %c1, %c0_0] : memref<2x18x128xbf16, #tpu.memory_space<vmem>>, vector<2x16x128xbf16>
    %1 = vector.shape_cast %0 : vector<2x16x128xbf16> to vector<32x128xbf16>
    %c0_1 = arith.constant 0 : index
    %c0_2 = arith.constant 0 : index
    %2 = vector.load %arg2[%c0_1, %c0_2] : memref<128x256xbf16, #tpu.memory_space<vmem>>, vector<128x256xbf16>
    %cst = arith.constant dense<0.000000e+00> : vector<32x256xf32>
    %3 = tpu.matmul %1, %2, %cst {dimension_numbers = #tpu.dot_dimension_numbers<[1], [0], [0], [1], [0, 0, 1, 1], [], []>} : vector<32x128xbf16>, vector<128x256xbf16>, vector<32x256xf32> -> vector<32x256xf32>
    %c0_3 = arith.constant 0 : index
    %c0_4 = arith.constant 0 : index
    %c0_5 = arith.constant 0 : index
    %4 = vector.load %arg0[%c0_3, %c0_4, %c0_5] : memref<2x18x128xbf16, #tpu.memory_space<vmem>>, vector<2x16x128xbf16>
    %5 = vector.shape_cast %4 : vector<2x16x128xbf16> to vector<32x128xbf16>
    %c0_6 = arith.constant 0 : index
    %c0_7 = arith.constant 0 : index
    %c0_8 = arith.constant 0 : index
    %6 = vector.load %arg1[%c0_6, %c0_7, %c0_8] : memref<2x128x128xbf16, #tpu.memory_space<vmem>>, vector<1x128x128xbf16>
    %7 = vector.shape_cast %6 : vector<1x128x128xbf16> to vector<128x128xbf16>
    %cst_9 = arith.constant dense<0.000000e+00> : vector<32x128xf32>
    %8 = tpu.matmul %5, %7, %cst_9 {dimension_numbers = #tpu.dot_dimension_numbers<[1], [0], [0], [1], [0, 0, 1, 1], [], []>} : vector<32x128xbf16>, vector<128x128xbf16>, vector<32x128xf32> -> vector<32x128xf32>
    %9 = vector.extract_strided_slice %3 {offsets = [0, 0], sizes = [32, 128], strides = [1, 1]} : vector<32x256xf32> to vector<32x128xf32>
    %10 = arith.addf %8, %9 : vector<32x128xf32>
    %c0_10 = arith.constant 0 : index
    %c2 = arith.constant 2 : index
    %c0_11 = arith.constant 0 : index
    %11 = vector.load %arg0[%c0_10, %c2, %c0_11] : memref<2x18x128xbf16, #tpu.memory_space<vmem>>, vector<2x16x128xbf16>
    %12 = vector.shape_cast %11 : vector<2x16x128xbf16> to vector<32x128xbf16>
    %c1_12 = arith.constant 1 : index
    %c0_13 = arith.constant 0 : index
    %c0_14 = arith.constant 0 : index
    %13 = vector.load %arg1[%c1_12, %c0_13, %c0_14] : memref<2x128x128xbf16, #tpu.memory_space<vmem>>, vector<1x128x128xbf16>
    %14 = vector.shape_cast %13 : vector<1x128x128xbf16> to vector<128x128xbf16>
    %cst_15 = arith.constant dense<0.000000e+00> : vector<32x128xf32>
    %15 = tpu.matmul %12, %14, %cst_15 {dimension_numbers = #tpu.dot_dimension_numbers<[1], [0], [0], [1], [0, 0, 1, 1], [], []>} : vector<32x128xbf16>, vector<128x128xbf16>, vector<32x128xf32> -> vector<32x128xf32>
    %16 = arith.addf %10, %15 : vector<32x128xf32>
    %17 = vector.extract_strided_slice %3 {offsets = [0, 128], sizes = [32, 128], strides = [1, 1]} : vector<32x256xf32> to vector<32x128xf32>
    %c0_16 = arith.constant 0 : index
    %c0_17 = arith.constant 0 : index
    %18 = vector.load %arg8[%c0_16, %c0_17] : memref<1x128xf32, #tpu.memory_space<vmem>>, vector<1x128xf32>
    %19 = vector.broadcast %18 : vector<1x128xf32> to vector<32x128xf32>
    %20 = arith.addf %17, %19 : vector<32x128xf32>
    %cst_18 = arith.constant dense<0.000000e+00> : vector<128xf32>
    %21 = vector.multi_reduction <add>, %16, %cst_18 [0] : vector<32x128xf32> to vector<128xf32>
    %22 = vector.shape_cast %21 : vector<128xf32> to vector<1x128xf32>
    %cst_19 = arith.constant 3.200000e+01 : f32
    %23 = vector.broadcast %cst_19 : f32 to vector<1x128xf32>
    %24 = arith.divf %22, %23 : vector<1x128xf32>
    %25 = vector.broadcast %24 : vector<1x128xf32> to vector<32x128xf32>
    %26 = arith.subf %16, %25 : vector<32x128xf32>
    %27 = arith.mulf %26, %26 : vector<32x128xf32>
    %cst_20 = arith.constant dense<0.000000e+00> : vector<128xf32>
    %28 = vector.multi_reduction <add>, %27, %cst_20 [0] : vector<32x128xf32> to vector<128xf32>
    %29 = vector.shape_cast %28 : vector<128xf32> to vector<1x128xf32>
    %cst_21 = arith.constant 3.200000e+01 : f32
    %30 = vector.broadcast %cst_21 : f32 to vector<1x128xf32>
    %31 = arith.divf %29, %30 : vector<1x128xf32>
    %c0_22 = arith.constant 0 : index
    %c0_23 = arith.constant 0 : index
    %32 = vector.load %arg3[%c0_22, %c0_23] : memref<1x128xf32, #tpu.memory_space<vmem>>, vector<1x128xf32>
    %cst_24 = arith.constant 9.99999974E-6 : f32
    %33 = vector.broadcast %cst_24 : f32 to vector<1x128xf32>
    %34 = arith.addf %31, %33 : vector<1x128xf32>
    %35 = math.rsqrt %34 : vector<1x128xf32>
    %36 = arith.mulf %32, %35 : vector<1x128xf32>
    %37 = vector.broadcast %36 : vector<1x128xf32> to vector<32x128xf32>
    %38 = arith.mulf %26, %37 : vector<32x128xf32>
    %c0_25 = arith.constant 0 : index
    %c0_26 = arith.constant 0 : index
    %39 = vector.load %arg4[%c0_25, %c0_26] : memref<1x128xf32, #tpu.memory_space<vmem>>, vector<1x128xf32>
    %40 = vector.broadcast %39 : vector<1x128xf32> to vector<32x128xf32>
    %41 = arith.addf %38, %40 : vector<32x128xf32>
    %cst_27 = arith.constant 0.000000e+00 : f32
    %42 = vector.broadcast %cst_27 : f32 to vector<32x128xf32>
    %43 = arith.maximumf %41, %42 : vector<32x128xf32>
    %44 = arith.truncf %43 : vector<32x128xf32> to vector<32x128xbf16>
    %cst_28 = arith.constant 0.000000e+00 : bf16
    %45 = vector.broadcast %cst_28 : bf16 to vector<2x1x128xbf16>
    %c0_29 = arith.constant 0 : index
    %c0_30 = arith.constant 0 : index
    %c0_31 = arith.constant 0 : index
    %46 = vector.load %arg10[%c0_29, %c0_30, %c0_31] : memref<2x18x128xbf16, #tpu.memory_space<vmem>>, vector<2x1x128xbf16>
    tpu.vector_store %arg10[%c0_29, %c0_30, %c0_31], %45 {strides = array<i32>} : memref<2x18x128xbf16, #tpu.memory_space<vmem>>, vector<2x1x128xbf16>,
    %c0_32 = arith.constant 0 : index
    %c17 = arith.constant 17 : index
    %c0_33 = arith.constant 0 : index
    %47 = vector.load %arg10[%c0_32, %c17, %c0_33] : memref<2x18x128xbf16, #tpu.memory_space<vmem>>, vector<2x1x128xbf16>
    tpu.vector_store %arg10[%c0_32, %c17, %c0_33], %45 {strides = array<i32>} : memref<2x18x128xbf16, #tpu.memory_space<vmem>>, vector<2x1x128xbf16>,
    %48 = vector.shape_cast %44 : vector<32x128xbf16> to vector<2x16x128xbf16>
    %c0_34 = arith.constant 0 : index
    %c1_35 = arith.constant 1 : index
    %c0_36 = arith.constant 0 : index
    %49 = vector.load %arg10[%c0_34, %c1_35, %c0_36] : memref<2x18x128xbf16, #tpu.memory_space<vmem>>, vector<2x16x128xbf16>
    tpu.vector_store %arg10[%c0_34, %c1_35, %c0_36], %48 {strides = array<i32>} : memref<2x18x128xbf16, #tpu.memory_space<vmem>>, vector<2x16x128xbf16>,
    %c1_37 = arith.constant 1 : index
    %c0_38 = arith.constant 0 : index
    %c0_39 = arith.constant 0 : index
    %50 = vector.load %arg5[%c1_37, %c0_38, %c0_39] : memref<3x128x128xbf16, #tpu.memory_space<vmem>>, vector<1x128x128xbf16>
    %51 = vector.shape_cast %50 : vector<1x128x128xbf16> to vector<128x128xbf16>
    %cst_40 = arith.constant dense<0.000000e+00> : vector<32x128xf32>
    %52 = tpu.matmul %44, %51, %cst_40 {dimension_numbers = #tpu.dot_dimension_numbers<[1], [0], [0], [1], [0, 0, 1, 1], [], []>} : vector<32x128xbf16>, vector<128x128xbf16>, vector<32x128xf32> -> vector<32x128xf32>
    %c0_41 = arith.constant 0 : index
    %c0_42 = arith.constant 0 : index
    %c0_43 = arith.constant 0 : index
    %53 = vector.load %arg10[%c0_41, %c0_42, %c0_43] : memref<2x18x128xbf16, #tpu.memory_space<vmem>>, vector<2x16x128xbf16>
    %54 = vector.shape_cast %53 : vector<2x16x128xbf16> to vector<32x128xbf16>
    %c0_44 = arith.constant 0 : index
    %c0_45 = arith.constant 0 : index
    %c0_46 = arith.constant 0 : index
    %55 = vector.load %arg5[%c0_44, %c0_45, %c0_46] : memref<3x128x128xbf16, #tpu.memory_space<vmem>>, vector<1x128x128xbf16>
    %56 = vector.shape_cast %55 : vector<1x128x128xbf16> to vector<128x128xbf16>
    %cst_47 = arith.constant dense<0.000000e+00> : vector<32x128xf32>
    %57 = tpu.matmul %54, %56, %cst_47 {dimension_numbers = #tpu.dot_dimension_numbers<[1], [0], [0], [1], [0, 0, 1, 1], [], []>} : vector<32x128xbf16>, vector<128x128xbf16>, vector<32x128xf32> -> vector<32x128xf32>
    %58 = arith.addf %52, %57 : vector<32x128xf32>
    %c0_48 = arith.constant 0 : index
    %c2_49 = arith.constant 2 : index
    %c0_50 = arith.constant 0 : index
    %59 = vector.load %arg10[%c0_48, %c2_49, %c0_50] : memref<2x18x128xbf16, #tpu.memory_space<vmem>>, vector<2x16x128xbf16>
    %60 = vector.shape_cast %59 : vector<2x16x128xbf16> to vector<32x128xbf16>
    %c2_51 = arith.constant 2 : index
    %c0_52 = arith.constant 0 : index
    %c0_53 = arith.constant 0 : index
    %61 = vector.load %arg5[%c2_51, %c0_52, %c0_53] : memref<3x128x128xbf16, #tpu.memory_space<vmem>>, vector<1x128x128xbf16>
    %62 = vector.shape_cast %61 : vector<1x128x128xbf16> to vector<128x128xbf16>
    %cst_54 = arith.constant dense<0.000000e+00> : vector<32x128xf32>
    %63 = tpu.matmul %60, %62, %cst_54 {dimension_numbers = #tpu.dot_dimension_numbers<[1], [0], [0], [1], [0, 0, 1, 1], [], []>} : vector<32x128xbf16>, vector<128x128xbf16>, vector<32x128xf32> -> vector<32x128xf32>
    %64 = arith.addf %58, %63 : vector<32x128xf32>
    %cst_55 = arith.constant dense<0.000000e+00> : vector<128xf32>
    %65 = vector.multi_reduction <add>, %64, %cst_55 [0] : vector<32x128xf32> to vector<128xf32>
    %66 = vector.shape_cast %65 : vector<128xf32> to vector<1x128xf32>
    %cst_56 = arith.constant 3.200000e+01 : f32
    %67 = vector.broadcast %cst_56 : f32 to vector<1x128xf32>
    %68 = arith.divf %66, %67 : vector<1x128xf32>
    %69 = vector.broadcast %68 : vector<1x128xf32> to vector<32x128xf32>
    %70 = arith.subf %64, %69 : vector<32x128xf32>
    %71 = arith.mulf %70, %70 : vector<32x128xf32>
    %cst_57 = arith.constant dense<0.000000e+00> : vector<128xf32>
    %72 = vector.multi_reduction <add>, %71, %cst_57 [0] : vector<32x128xf32> to vector<128xf32>
    %73 = vector.shape_cast %72 : vector<128xf32> to vector<1x128xf32>
    %cst_58 = arith.constant 3.200000e+01 : f32
    %74 = vector.broadcast %cst_58 : f32 to vector<1x128xf32>
    %75 = arith.divf %73, %74 : vector<1x128xf32>
    %c0_59 = arith.constant 0 : index
    %c0_60 = arith.constant 0 : index
    %76 = vector.load %arg6[%c0_59, %c0_60] : memref<1x128xf32, #tpu.memory_space<vmem>>, vector<1x128xf32>
    %cst_61 = arith.constant 9.99999974E-6 : f32
    %77 = vector.broadcast %cst_61 : f32 to vector<1x128xf32>
    %78 = arith.addf %75, %77 : vector<1x128xf32>
    %79 = math.rsqrt %78 : vector<1x128xf32>
    %80 = arith.mulf %76, %79 : vector<1x128xf32>
    %81 = vector.broadcast %80 : vector<1x128xf32> to vector<32x128xf32>
    %82 = arith.mulf %70, %81 : vector<32x128xf32>
    %c0_62 = arith.constant 0 : index
    %c0_63 = arith.constant 0 : index
    %83 = vector.load %arg7[%c0_62, %c0_63] : memref<1x128xf32, #tpu.memory_space<vmem>>, vector<1x128xf32>
    %84 = vector.broadcast %83 : vector<1x128xf32> to vector<32x128xf32>
    %85 = arith.addf %82, %84 : vector<32x128xf32>
    %cst_64 = arith.constant 0.000000e+00 : f32
    %86 = vector.broadcast %cst_64 : f32 to vector<32x128xf32>
    %87 = arith.maximumf %85, %86 : vector<32x128xf32>
    %88 = arith.addf %87, %20 : vector<32x128xf32>
    %89 = vector.shape_cast %88 : vector<32x128xf32> to vector<2x16x128xf32>
    %c0_65 = arith.constant 0 : index
    %c0_66 = arith.constant 0 : index
    %c0_67 = arith.constant 0 : index
    %90 = vector.load %arg9[%c0_65, %c0_66, %c0_67] : memref<2x16x128xf32, #tpu.memory_space<vmem>>, vector<2x16x128xf32>
    tpu.vector_store %arg9[%c0_65, %c0_66, %c0_67], %89 {strides = array<i32>} : memref<2x16x128xf32, #tpu.memory_space<vmem>>, vector<2x16x128xf32>,
    return
  }
}

</mosaic_0001>

<bundles_post_ra>
// kernel: tpu_custom_call.1
= control target key start
LH: loop header
LB: loop body
LE: loop exit
PB: predicated region body
PF: predicated region fallthrough
CT: control target
= control target key end

     0   :  { %14 = vsyncpa [#allocation4], 0  ;;  %s1897_s0 = inlined_call_operand.vmem [shape: bf16[2,18,128], index: 0, kind: input, shape index: {}]   ;;  %s1898_s1 = inlined_call_operand.hbm [shape: bf16[2,128,128], index: 1, kind: input, shape index: {}]   ;;  %s1899_s2 = inlined_call_operand.hbm [shape: bf16[128,256], index: 2, kind: input, shape index: {}]   ;;  %s1900_s3 = inlined_call_operand.vmem [shape: f32[1,128], index: 3, kind: input, shape index: {}]   ;;  %s1901_s4 = inlined_call_operand.vmem [shape: f32[1,128], index: 4, kind: input, shape index: {}]   ;;  %s1902_s5 = inlined_call_operand.hbm [shape: bf16[3,128,128], index: 5, kind: input, shape index: {}]   ;;  %s1903_s6 = inlined_call_operand.vmem [shape: f32[1,128], index: 6, kind: input, shape index: {}]   ;;  %s1904_s7 = inlined_call_operand.vmem [shape: f32[1,128], index: 7, kind: input, shape index: {}]   ;;  %s1905_s8 = inlined_call_operand.vmem [shape: f32[1,128], index: 8, kind: input, shape index: {}]   ;;  %s1906_s9 = inlined_call_operand.hbm [shape: f32[2,16,128], index: 9, kind: output, shape index: {}]  }
   0x1   :  { %15 = vsyncpa [#allocation7], 0 }
   0x2   :  { %16 = vsyncpa [#allocation5], 0  ;;  %s1617_s30 = smov [#allocation6]   ;;  %s1523_s13 = scalar_lea.hbm %s1899_s2, 2048 }
   0x3   :  { %s36_s10 = sshll.u32 %s1617_s30, 4  ;;  %p1524_p0 = scmp.ne.s32.totalorder %s1899_s2, %s1523_s13  ;;  %s37_s10 = int_to_ptr.vmem [resolvable:$true] %s36_s10 }
   0x4   :  { %p1527_p1 = scmp.lt.u32.totalorder %s1523_s13, %s1899_s2 }
   0x6   :  { %p1529_p2 = pnand %p1527_p1, %p1524_p0 }
   0x8   :  { %1532 = shalt.err (!%p1529_p2)
}
   0x9   :  { %s1533_s18 = scalar_lea.vmem %s37_s10, 2048  ;;  %p1538_p4 = scmp.lt.s32.totalorder %s37_s10, %s37_s10 }
   0xa   :  { %p1534_p3 = scmp.ne.s32.totalorder %s37_s10, %s1533_s18  ;;  %p1539_p5 = scmp.lt.s32.totalorder %s1533_s18, %s1533_s18 }
   0xc   :  { %p1540_p6 = por %p1539_p5, %p1538_p4 }
   0xe   :  { %p1541_p7 = pnand %p1540_p6, %p1534_p3 }
  0x10   :  { %1544 = shalt.err (!%p1541_p7)
}
  0x11   :  { %s1618_s19 = smov 128   ;;  %s1619_s20 = smov 8  }
  0x12   :  { %42 = dma.hbm_to_vmem [thread:$0]  %s1899_s2, 2048, %s37_s10, [#allocation7], %s1618_s19, %s1618_s19, %s1619_s20  }
  0x13   :  { %s1620_s23 = smov [#allocation3]   ;;  %s1545_s27 = scalar_lea.hbm %s1898_s1, 2048 }
  0x14   :  { %s24_s24 = sshll.u32 %s1620_s23, 4  ;;  %p1546_p8 = scmp.ne.s32.totalorder %s1898_s1, %s1545_s27  ;;  %s25_s24 = int_to_ptr.vmem [resolvable:$true] %s24_s24 }
  0x15   :  { %p1549_p9 = scmp.lt.u32.totalorder %s1545_s27, %s1898_s1 }
  0x17   :  { %p1551_p10 = pnand %p1549_p9, %p1546_p8 }
  0x19   :  { %1554 = shalt.err (!%p1551_p10)
}
  0x1a   :  { %s1555_s12 = scalar_lea.vmem %s25_s24, 2048  ;;  %p1560_p12 = scmp.lt.s32.totalorder %s25_s24, %s25_s24 }
  0x1b   :  { %p1556_p11 = scmp.ne.s32.totalorder %s25_s24, %s1555_s12  ;;  %p1561_p13 = scmp.lt.s32.totalorder %s1555_s12, %s1555_s12 }
  0x1d   :  { %p1562_p0 = por %p1561_p13, %p1560_p12 }
  0x1f   :  { %p1563_p1 = pnand %p1562_p0, %p1556_p11 }
  0x21   :  { %1566 = shalt.err (!%p1563_p1)
}
  0x22   :  { %s1621_s2 = smov 64   ;;  %s1622_s10 = smov 4  }
  0x23   :  { %30 = dma.hbm_to_vmem [thread:$0]  %s1898_s1, 2048, %s25_s24, [#allocation4], %s1621_s2, %s1621_s2, %s1622_s10  }
  0x24   :  { %s1623_s15 = smov [#allocation8]   ;;  %s1567_s21 = scalar_lea.hbm %s1902_s5, 3072 }
  0x25   :  { %s52_s16 = sshll.u32 %s1623_s15, 4  ;;  %p1568_p2 = scmp.ne.s32.totalorder %s1902_s5, %s1567_s21  ;;  %s53_s16 = int_to_ptr.vmem [resolvable:$true] %s52_s16 }
  0x26   :  { %p1571_p3 = scmp.lt.u32.totalorder %s1567_s21, %s1902_s5 }
  0x28   :  { %p1573_p4 = pnand %p1571_p3, %p1568_p2 }
  0x2a   :  { %1576 = shalt.err (!%p1573_p4)
}
  0x2b   :  { %s1577_s27 = scalar_lea.vmem %s53_s16, 3072  ;;  %p1582_p6 = scmp.lt.s32.totalorder %s53_s16, %s53_s16 }
  0x2c   :  { %p1578_p5 = scmp.ne.s32.totalorder %s53_s16, %s1577_s27  ;;  %p1583_p7 = scmp.lt.s32.totalorder %s1577_s27, %s1577_s27 }
  0x2e   :  { %p1584_p8 = por %p1583_p7, %p1582_p6 }
  0x30   :  { %p1585_p9 = pnand %p1584_p8, %p1578_p5 }
  0x32   :  { %1588 = shalt.err (!%p1585_p9)
}
  0x33   :  { %58 = dma.hbm_to_vmem [thread:$0]  %s1902_s5, 3072, %s53_s16, [#allocation7], %s1621_s2, %s1621_s2, %s1622_s10  }
  0x34   :  { %1611 = dma.done.wait [#allocation4], 2048  }
  0x35   :  { %1612 = vsyncadd [#allocation4], 4294965248 }
  0x36   :  { %1613 = dma.done.wait [#allocation7], 5120  }
  0x37   :  { %1614 = vsyncadd [#allocation7], 4294962176  ;;  %v1624_v0 = vmov 0   ;;  %v1451_v1 = vld [vmem:[#allocation6 + $0x4] ss:$8 sps:$4 sm:$0xff]   ;;  %v1477_v57 = vld [vmem:[#allocation3 + $0x10] sm:$0xff]  }
  0x38   :  { %268 = vmatprep.mubr.bf16.mxu0 %v1624_v0  ;;  %v1453_v2 = vld [vmem:[#allocation6] ss:$8 sps:$4 sm:$0xff]   ;;  %236 = vmatprep.subr.bf16.mxu0 %v1451_v1  ;;  %v1454_v3 = vld [vmem:[#allocation6 + $0x14] ss:$8 sps:$4 sm:$0xff]   ;;  %v1456_v4 = vld [vmem:[#allocation6 + $0x10] ss:$8 sps:$4 sm:$0xff]  }
  0x39   :  { %237 = vmatpush1.bf16.msra.mxu0 %v1453_v2  ;;  %v1457_v5 = vld [vmem:[#allocation6 + $0x24] ss:$8 sps:$4 sm:$0xff]   ;;  %v1459_v6 = vld [vmem:[#allocation6 + $0x20] ss:$8 sps:$4 sm:$0xff]   ;;  %v1460_v7 = vld [vmem:[#allocation6 + $0x34] ss:$8 sps:$4 sm:$0xff]  }
  0x3a   :  { %238 = vmatprep.subr.bf16.mxu0 %v1454_v3  ;;  %v75_v8 = vld [vmem:[%s1897_s0] sm:$0xf]  ;;  %v1722_v10 = vld [vmem:[%s1897_s0 + $0x4] sm:$0xf]  ;;  %v1463_v13 = vld [vmem:[#allocation6 + $0x44] ss:$8 sps:$4 sm:$0xff]  }
  0x3b   :  { %v1462_v9 = vld [vmem:[#allocation6 + $0x30] ss:$8 sps:$4 sm:$0xff]   ;;  %v85_v11 = vshrl.u32 %v75_v8, 16  ;;  %v88_v12 = vshll.u32 %v75_v8, 16  ;;  %vm81_vm0 = vsmask.f32 3328 }
  0x3c   :  { %vm82_vm1 = vsmask.f32 7440  ;;  %v94_v14 = vshll.u32 %v1722_v10, 16  ;;  %v98_v15 = vshrl.u32 %v1722_v10, 16  ;;  %v1729_v18 = vld [vmem:[%s1897_s0 + $0x8] sm:$0x1] }
  0x3d   :  { %239 = vmatpush1.bf16.msra.mxu0 %v1456_v4  ;;  %v87_v16 = vrot.slane %v85_v11, 4  ;;  %v90_v17 = vrot.slane %v88_v12, 5  ;;  %v1465_v21 = vld [vmem:[#allocation6 + $0x40] ss:$8 sps:$4 sm:$0xff]   ;;  %v1466_v22 = vld [vmem:[#allocation6 + $0x54] ss:$8 sps:$4 sm:$0xff]   ;;  %vm1749_vm2 = vmor %vm81_vm0, %vm82_vm1 }
  0x3e   :  { %240 = vmatprep.subr.bf16.mxu0 %v1457_v5  ;;  %v96_v19 = vrot.slane %v94_v14, 5  ;;  %v100_v20 = vrot.slane %v98_v15, 4  ;;  %v104_v25 = vshll.u32 %v1729_v18, 16  ;;  %v1468_v26 = vld [vmem:[#allocation6 + $0x50] ss:$8 sps:$4 sm:$0xff]   ;;  %v1475_v51 = vld [vmem:[#allocation3] sm:$0xff]  }
  0x3f   :  { %v91_v23 = vor.u32 %v90_v17, %v87_v16  ;;  %v1469_v27 = vld [vmem:[#allocation6 + $0x64] ss:$8 sps:$4 sm:$0xff]   ;;  %v78_v28 = vld [vmem:[%s1897_s0 + $0xc] sm:$0xf]  ;;  %v1738_v29 = vld [vmem:[%s1897_s0 + $0x10] sm:$0xf] }
  0x40   :  { %v101_v24 = vor.u32 %v100_v20, %v96_v19  ;;  %v109_v30 = vshrl.u32 %v78_v28, 16  ;;  %v112_v31 = vshll.u32 %v78_v28, 16  ;;  %v118_v32 = vshll.u32 %v1738_v29, 16  ;;  %v1471_v33 = vld [vmem:[#allocation6 + $0x60] ss:$8 sps:$4 sm:$0xff]   ;;  %v1483_v60 = vld [vmem:[%s1897_s0] sm:$0xff]  }
  0x41   :  { %241 = vmatpush1.bf16.msra.mxu0 %v1459_v6  ;;  %v92_v34 = vrot.slane %v91_v23, 4  ;;  %v106_v36 = vrot.slane %v104_v25, 5  ;;  %v122_v37 = vshrl.u32 %v1738_v29, 16  ;;  %v1472_v38 = vld [vmem:[#allocation6 + $0x74] ss:$8 sps:$4 sm:$0xff]   ;;  %v1476_v56 = vld [vmem:[#allocation3 + $0x8] sm:$0xff]  }
  0x42   :  { %242 = vmatprep.subr.bf16.mxu0 %v1460_v7  ;;  %v102_v35 = vrot.slane %v101_v24, 4  ;;  %v1745_v39 = vld [vmem:[%s1897_s0 + $0x14] sm:$0x1]  ;;  %v111_v40 = vrot.slane %v109_v30, 4  ;;  %v114_v41 = vrot.slane %v112_v31, 5  ;;  %v120_v43 = vrot.slane %v118_v32, 5 }
  0x43   :  { %v124_v44 = vrot.slane %v122_v37, 4  ;;  %v128_v45 = vshll.u32 %v1745_v39, 16  ;;  %v1474_v46 = vld [vmem:[#allocation6 + $0x70] ss:$8 sps:$4 sm:$0xff]   ;;  %v97_v47 = vsel %vm1749_vm2, %v92_v34, %v96_v19  ;;  %v1479_v63 = vld [vmem:[#allocation3 + $0x20] sm:$0xff]   ;;  %v431_v2 = vrot.slane %v1722_v10, 5 }
  0x44   :  { %v107_v48 = vsel %vm1749_vm2, %v102_v35, %v106_v36  ;;  %v115_v49 = vor.u32 %v114_v41, %v111_v40  ;;  %v1478_v61 = vld [vmem:[#allocation3 + $0x18] sm:$0xff]   ;;  %v1481_v1 = vld [vmem:[#allocation3 + $0x30] sm:$0xff]   ;;  %vm426_vm3 = vcmask 1042432   ;;  %vm427_vm4 = vcmask 1046532   ;;  %v1486_v14 = vld [vmem:[#allocation3 + $0x48] sm:$0xff]  }
  0x45   :  { %243 = vmatpush1.bf16.msra.mxu0 %v1462_v9  ;;  %v125_v50 = vor.u32 %v124_v44, %v120_v43  ;;  %v1203_v52 = vcombine.low %v97_v47, %v107_v48  ;;  %v130_v53 = vrot.slane %v128_v45, 5  ;;  %v418_v3 = vld [vmem:[%s1897_s0] sm:$0xe]  ;;  %v1482_v4 = vld [vmem:[#allocation3 + $0x38] sm:$0xff]   ;;  %v433_v6 = vrot.slane %v431_v2, 4  ;;  %vm1771_vm5 = vmor %vm426_vm3, %vm427_vm4 }
  0x46   :  { %244 = vmatprep.subr.bf16.mxu0 %v1463_v13  ;;  %v116_v54 = vrot.slane %v115_v49, 4  ;;  %v1231_v5 = vrot.slane %v418_v3, 9  ;;  %v434_v7 = vrot.slane %v1729_v18, 5  ;;  %v1485_v9 = vld [vmem:[#allocation3 + $0x40] sm:$0xff]   ;;  %v1487_v15 = vld [vmem:[#allocation3 + $0x50] sm:$0xff]   ;;  %v1488_v16 = vld [vmem:[#allocation3 + $0x58] sm:$0xff]  }
  0x47   :  { %v126_v55 = vrot.slane %v125_v50, 4  ;;  %v1484_v12 = vld [vmem:[%s1897_s0 + $0xc] sm:$0xff]   ;;  %v1490_v18 = vld [vmem:[#allocation3 + $0x68] sm:$0xff]   ;;  %v438_v19 = vrot.slane %v1738_v29, 5  ;;  %v1491_v20 = vld [vmem:[#allocation3 + $0x70] sm:$0xff]   ;;  %vm640_vm6 = vcmask 1040384  }
  0x48   :  { %v121_v58 = vsel %vm1749_vm2, %v116_v54, %v120_v43  ;;  %v432_v10 = vsel %vm1771_vm5, %v1231_v5, %v431_v2  ;;  %v435_v11 = vsel %vm1771_vm5, %v433_v6, %v434_v7  ;;  %v1489_v17 = vld [vmem:[#allocation3 + $0x60] sm:$0xff]   ;;  %v1492_v25 = vld [vmem:[#allocation3 + $0x78] sm:$0xff]   ;;  %v1494_v30 = vld [vmem:[#allocation8 + $0x8] sm:$0xff]   ;;  %vm641_vm7 = vsmask.f32 256 }
  0x49   :  { %245 = vmatpush1.bf16.msra.mxu0 %v1465_v21  ;;  %v131_v59 = vsel %vm1749_vm2, %v126_v55, %v130_v53  ;;  %v1233_v13 = vcombine.low %v432_v10, %v435_v11  ;;  %v419_v21 = vld [vmem:[%s1897_s0 + $0xc] sm:$0xe]  ;;  %v440_v24 = vrot.slane %v438_v19, 4  ;;  %v1493_v29 = vld [vmem:[#allocation8] sm:$0xff]   ;;  %v1495_v34 = vld [vmem:[#allocation8 + $0x10] sm:$0xff]   ;;  %vm709_vm12 = vcmask 1043456  }
  0x4a   :  { %246 = vmatprep.subr.bf16.mxu0 %v1466_v22  ;;  %v1204_v62 = vcombine.low %v121_v58, %v131_v59  ;;  %v441_v22 = vrot.slane %v1745_v39, 5  ;;  %v1232_v23 = vrot.slane %v419_v21, 9  ;;  %1374 = vmatprep.subr.bf16.mxu1 %v1493_v29  ;;  %vm649_vm8 = vsmask.f32 7938  ;;  %v1496_v36 = vld [vmem:[#allocation8 + $0x18] sm:$0xff]   ;;  %vm1796_vm9 = vmand %vm640_vm6, %vm641_vm7  ;;  %v1497_v49 = vld [vmem:[#allocation8 + $0x20] sm:$0xff]  }
  0x4b   :  { %1375 = vmatpush3.bf16.msra.mxu1 %v1493_v29  ;;  %v646_v39 = vld [vmem:[#allocation2 + $0xc] sm:$0x1]  ;;  %vm650_vm10 = vmand %vm640_vm6, %vm649_vm8  ;;  %v651_v43 = vld [vmem:[#allocation2 + $0x8] sm:$0x1]  ;;  %vm667_vm11 = vsmask.f32 4368 }
  0x4c   :  { %1376 = vmatprep.subr.bf16.mxu1 %v1494_v30  ;;  %v647_v42 = vsel %vm1796_vm9, 0, %v646_v39  ;;  %v652_v45 = vsel %vm650_vm10, 0, %v651_v43  ;;  %v1500_v53 = vld [vmem:[#allocation8 + $0x38] sm:$0xff]   ;;  %v1809_v54 = vld [vmem:[#allocation8 + $0x40] sm:$0xff]   ;;  %vm1834_vm13 = vmor %vm641_vm7, %vm667_vm11 }
  0x4d   :  { %247 = vmatpush1.bf16.msra.mxu0 %v1468_v26  ;;  %v439_v26 = vsel %vm1771_vm5, %v1232_v23, %v438_v19  ;;  %648 = vst [vmem:[#allocation2 + $0xc] sm:$0x1] %v647_v42  ;;  %653 = vst [vmem:[#allocation2 + $0x8] sm:$0x1] %v652_v45  ;;  %v609_v42 = vld [vmem:[%s1900_s3] sm:$0x1] }
  0x4e   :  { %248 = vmatprep.subr.bf16.mxu0 %v1469_v27  ;;  %v442_v27 = vsel %vm1771_vm5, %v440_v24, %v441_v22  ;;  %vm1839_vm14 = vmand %vm709_vm12, %vm649_vm8  ;;  %v1507_v37 = vld [vmem:[#allocation8 + $0x60] sm:$0xff]  }
  0x4f   :  { %v1234_v28 = vcombine.low %v439_v26, %v442_v27  ;;  %1377 = vmatpush3.bf16.msra.mxu1 %v1494_v30 }
  0x50   :  { %1378 = vmatprep.subr.bf16.mxu1 %v1495_v34 }
  0x51   :  { %249 = vmatpush1.bf16.msra.mxu0 %v1471_v33 }
  0x52   :  { %250 = vmatprep.subr.bf16.mxu0 %v1472_v38  ;;  %v643_v38 = vld [vmem:[#allocation2] sm:$0x1] }
  0x53   :  { %1379 = vmatpush3.bf16.msra.mxu1 %v1495_v34  ;;  %v644_v41 = vsel %vm1796_vm9, 0, %v643_v38 }
  0x54   :  { %1380 = vmatprep.subr.bf16.mxu1 %v1496_v36  ;;  %645 = vst [vmem:[#allocation2] sm:$0x1] %v644_v41 }
  0x55   :  { %251 = vmatpush1.bf16.msra.mxu0 %v1474_v46  ;;  %v654_v46 = vld [vmem:[#allocation2 + $0x14] sm:$0x1] }
  0x56   :  { %1334 = vmatprep.subr.bf16.mxu0 %v1475_v51  ;;  %v655_v48 = vsel %vm650_vm10, 0, %v654_v46 }
  0x57   :  { %1381 = vmatpush3.bf16.msra.mxu1 %v1496_v36  ;;  %656 = vst [vmem:[#allocation2 + $0x14] sm:$0x1] %v655_v48  ;;  %v1244_v48 = vld [vmem:[%s1901_s4] ss:$0 sm:$0xff] }
  0x58   :  { %269 = vmatmul.mubr.bf16.vlgmr.msra.gmra.mrb[0].mxu0 %v1203_v52  ;;  %1382 = vmatprep.subr.bf16.mxu1 %v1497_v49  ;;  %v1499_v52 = vld [vmem:[#allocation8 + $0x30] sm:$0xff]  }
  0x59   :  { %1335 = vmatpush3.bf16.msra.mxu0 %v1475_v51  ;;  %278 = vmatprep.mubr.bf16.mxu0 %v1624_v0  ;;  %v1480_v0 = vld [vmem:[#allocation3 + $0x28] sm:$0xff]  }
  0x5a   :  { %1336 = vmatprep.subr.bf16.mxu0 %v1476_v56  ;;  %v1498_v51 = vld [vmem:[#allocation8 + $0x28] sm:$0xff]  }
  0x5b   :  { %1383 = vmatpush3.bf16.msra.mxu1 %v1497_v49 }
  0x5c   :  { %1384 = vmatprep.subr.bf16.mxu1 %v1498_v51 }
  0x5d   :  { %1337 = vmatpush3.bf16.msra.mxu0 %v1476_v56 }
  0x5e   :  { %1338 = vmatprep.subr.bf16.mxu0 %v1477_v57 }
  0x5f   :  { %1385 = vmatpush3.bf16.msra.mxu1 %v1498_v51 }
  0x60   :  { %279 = vmatmul.mubr.bf16.gmra.mrb[4].mxu0 %v1204_v62  ;;  %1386 = vmatprep.subr.bf16.mxu1 %v1499_v52 }
  0x61   :  { %1339 = vmatpush3.bf16.msra.mxu0 %v1477_v57  ;;  %1350 = vmatprep.mubr.bf16.mxu0 %v1483_v60 }
  0x62   :  { %1340 = vmatprep.subr.bf16.mxu0 %v1478_v61 }
  0x63   :  { %1387 = vmatpush3.bf16.msra.mxu1 %v1499_v52 }
  0x64   :  { %1388 = vmatprep.subr.bf16.mxu1 %v1500_v53 }
  0x65   :  { %1341 = vmatpush3.bf16.msra.mxu0 %v1478_v61 }
  0x66   :  { %1342 = vmatprep.subr.bf16.mxu0 %v1479_v63 }
  0x67   :  { %1389 = vmatpush3.bf16.msra.mxu1 %v1500_v53 }
  0x68   :  { %1394 = vmatprep.subr.bf16.mxu1 %v1809_v54 }
  0x69   :  { %1343 = vmatpush3.bf16.msra.mxu0 %v1479_v63 }
  0x6a   :  { %1344 = vmatprep.subr.bf16.mxu0 %v1480_v0 }
  0x6d   :  { %1345 = vmatpush3.bf16.msra.mxu0 %v1480_v0 }
  0x6e   :  { %1346 = vmatprep.subr.bf16.mxu0 %v1481_v1 }
  0x71   :  { %1347 = vmatpush3.bf16.msra.mxu0 %v1481_v1 }
  0x72   :  { %1348 = vmatprep.subr.bf16.mxu0 %v1482_v4 }
  0x75   :  { %1349 = vmatpush3.bf16.msra.mxu0 %v1482_v4 }
  0x76   :  { %1354 = vmatprep.subr.bf16.mxu0 %v1485_v9 }
  0x78   :  { %1351 = vmatmul.mubr.bf16.vlgmr.msra.gmra.mrb[8].mxu0 %v1484_v12 }
  0x79   :  { %1355 = vmatpush3.bf16.msra.mxu0 %v1485_v9  ;;  %1370 = vmatprep.mubr.bf16.mxu0 %v1233_v13 }
  0x7a   :  { %1356 = vmatprep.subr.bf16.mxu0 %v1486_v14 }
  0x7d   :  { %1357 = vmatpush3.bf16.msra.mxu0 %v1486_v14 }
  0x7e   :  { %1358 = vmatprep.subr.bf16.mxu0 %v1487_v15 }
  0x81   :  { %1359 = vmatpush3.bf16.msra.mxu0 %v1487_v15 }
  0x82   :  { %1360 = vmatprep.subr.bf16.mxu0 %v1488_v16 }
  0x85   :  { %1361 = vmatpush3.bf16.msra.mxu0 %v1488_v16 }
  0x86   :  { %1362 = vmatprep.subr.bf16.mxu0 %v1489_v17 }
  0x89   :  { %1363 = vmatpush3.bf16.msra.mxu0 %v1489_v17 }
  0x8a   :  { %1364 = vmatprep.subr.bf16.mxu0 %v1490_v18 }
  0x8d   :  { %1365 = vmatpush3.bf16.msra.mxu0 %v1490_v18 }
  0x8e   :  { %1366 = vmatprep.subr.bf16.mxu0 %v1491_v20 }
  0x91   :  { %1367 = vmatpush3.bf16.msra.mxu0 %v1491_v20 }
  0x92   :  { %1368 = vmatprep.subr.bf16.mxu0 %v1492_v25 }
  0x95   :  { %1369 = vmatpush3.bf16.msra.mxu0 %v1492_v25 }
  0x98   :  { %1371 = vmatmul.mubr.bf16.vlgmr.msra.gmra.mrb[12].mxu0 %v1234_v28 }
 0x12b   :  { %v270_v31 = vpop.f32.mrb[0].mxu0 }
 0x12c   :  { %v1791_v32 = vpop.f32.mrb[1].mxu0 }
 0x12d   :  { %v274_v33 = vpop.f32.mrb[2].mxu0 }
 0x12e   :  { %v1793_v35 = vpop.f32.mrb[3].mxu0 }
 0x133   :  { %v280_v40 = vpop.f32.mrb[4].mxu0 }
 0x134   :  { %v1805_v44 = vpop.f32.mrb[5].mxu0 }
 0x135   :  { %v284_v47 = vpop.f32.mrb[6].mxu0 }
 0x136   :  { %v1807_v50 = vpop.f32.mrb[7].mxu0 }
 0x14b   :  { %v1352_v55 = vpop.f32.mrb[8].mxu0 }
 0x14c   :  { %v412_v56 = vadd.f32 %v1352_v55, %v280_v40  ;;  %v403_v57 = vpop.f32.mrb[9].mxu0  ;;  %v614_v40 = vlaneseq }
 0x14d   :  { %v404_v58 = vadd.f32 %v403_v57, %v270_v31  ;;  %v1353_v59 = vpop.f32.mrb[10].mxu0 }
 0x14e   :  { %v415_v60 = vadd.f32 %v1353_v59, %v284_v47  ;;  %v406_v61 = vpop.f32.mrb[11].mxu0  ;;  %v1812_v41 = vshrl.u32 %v614_v40, 7 }
 0x14f   :  { %v407_v62 = vadd.f32 %v406_v61, %v274_v33 }
 0x150   :  { %v616_v43 = vsub.s32 0, %v1812_v41 }
 0x16b   :  { %v1372_v63 = vpop.f32.mrb[12].mxu0 }
 0x16c   :  { %v567_v0 = vadd.f32 %v1372_v63, %v412_v56  ;;  %v550_v1 = vpop.f32.mrb[13].mxu0 }
 0x16d   :  { %v565_v2 = vadd.f32 %v550_v1, %v404_v58  ;;  %v1373_v3 = vpop.f32.mrb[14].mxu0 }
 0x16e   :  { %v568_v4 = vadd.f32 %v1373_v3, %v415_v60  ;;  %v553_v5 = vpop.f32.mrb[15].mxu0 }
 0x16f   :  { %v566_v6 = vadd.f32 %v553_v5, %v407_v62 }
 0x171   :  { %v580_v7 = vadd.f32 %v566_v6, %v565_v2 }
 0x173   :  { %v581_v9 = vadd.f32 %v580_v7, %v567_v0 }
 0x175   :  { %v582_v10 = vadd.f32 %v581_v9, %v568_v4 }
 0x177   :  { %v583_v11 = vrot.slane %v582_v10, 4 }
 0x179   :  { %v584_v12 = vadd.f32 %v583_v11, %v582_v10  ;;  %v1517_v10 = vld [vmem:[#allocation8 + $0xb0] sm:$0xff]  }
 0x17b   :  { %v585_v13 = vrot.slane %v584_v12, 2 }
 0x17d   :  { %v586_v14 = vadd.f32 %v585_v13, %v584_v12 }
 0x17f   :  { %v587_v15 = vrot.slane %v586_v14, 1 }
 0x181   :  { %v588_v16 = vadd.f32 %v587_v15, %v586_v14  ;;  %v711_v15 = vld [vmem:[#allocation2] sm:$0xf] }
 0x183   :  { %v590_v17 = vmul.f32 0.03125, %v588_v16 }
 0x185   :  { %v591_v18 = vsub.f32 %v565_v2, %v590_v17  ;;  %v592_v19 = vsub.f32 %v566_v6, %v590_v17  ;;  %v593_v20 = vsub.f32 %v567_v0, %v590_v17  ;;  %v594_v21 = vsub.f32 %v568_v4, %v590_v17 }
 0x187   :  { %v595_v22 = vmul.f32 %v591_v18, %v591_v18  ;;  %v596_v23 = vmul.f32 %v592_v19, %v592_v19  ;;  %v597_v24 = vmul.f32 %v593_v20, %v593_v20  ;;  %v598_v26 = vmul.f32 %v594_v21, %v594_v21 }
 0x189   :  { %v599_v25 = vadd.f32 %v596_v23, %v595_v22 }
 0x18b   :  { %v600_v27 = vadd.f32 %v599_v25, %v597_v24 }
 0x18d   :  { %v601_v28 = vadd.f32 %v600_v27, %v598_v26  ;;  %v718_v26 = vld [vmem:[#allocation2 + $0xc] sm:$0xf]  ;;  %v722_v27 = vld [vmem:[#allocation2 + $0x14] sm:$0x1] }
 0x18f   :  { %v602_v29 = vrot.slane %v601_v28, 4 }
 0x191   :  { %v603_v30 = vadd.f32 %v602_v29, %v601_v28 }
 0x193   :  { %v604_v31 = vrot.slane %v603_v30, 2 }
 0x195   :  { %v605_v33 = vadd.f32 %v604_v31, %v603_v30 }
 0x197   :  { %v606_v34 = vrot.slane %v605_v33, 1 }
 0x199   :  { %v607_v36 = vadd.f32 %v606_v34, %v605_v33 }
 0x19b   :  { %v608_v38 = vmul.f32 0.03125, %v607_v36 }
 0x19d   :  { %v610_v39 = vadd.f32 1e-05, %v608_v38 }
 0x19f   :  { %1519 = vrsqrt.f32 %v610_v39 }
 0x1a9   :  { %v1520_v45 = vpop.eup %1519 }
 0x1aa   :  { %v612_v46 = vmul.f32 %v1520_v45, %v609_v42  ;;  %v1504_v42 = vld [vmem:[#allocation8 + $0x48] sm:$0xff]  }
 0x1ac   :  { %v617_v47 = vrot.slane %v612_v46, %v616_v43 }
 0x1ae   :  { %v619_v49 = vmul.f32 %v617_v47, %v591_v18  ;;  %v620_v51 = vmul.f32 %v617_v47, %v592_v19  ;;  %v621_v52 = vmul.f32 %v617_v47, %v593_v20  ;;  %v622_v53 = vmul.f32 %v617_v47, %v594_v21  ;;  %v715_v21 = vld [vmem:[#allocation2 + $0x8] sm:$0x1] }
 0x1af   :  { %v1505_v47 = vld [vmem:[#allocation8 + $0x50] sm:$0xff]  }
 0x1b0   :  { %v630_v55 = vadd.f32 %v1244_v48, %v619_v49  ;;  %v631_v56 = vadd.f32 %v1244_v48, %v620_v51  ;;  %v632_v57 = vadd.f32 %v1244_v48, %v621_v52  ;;  %v633_v58 = vadd.f32 %v1244_v48, %v622_v53  ;;  %v1506_v48 = vld [vmem:[#allocation8 + $0x58] sm:$0xff]   ;;  %v1508_v49 = vld [vmem:[#allocation8 + $0x68] sm:$0xff]   ;;  %v1509_v52 = vld [vmem:[#allocation8 + $0x70] sm:$0xff]  }
 0x1b2   :  { %v634_v59 = vmax.f32 %v630_v55, 0.0  ;;  %v635_v60 = vmax.f32 %v631_v56, 0.0  ;;  %v1823_v61 = vmax.f32 %v632_v57, 0.0  ;;  %v1825_v62 = vmax.f32 %v633_v58, 0.0  ;;  %v1511_v58 = vld [vmem:[#allocation8 + $0x80] sm:$0xff]  }
 0x1b4   :  { %v1280_v63 = vpack.c.bf16 %v634_v59, %v634_v59  ;;  %v1281_v0 = vpack.c.bf16 %v635_v60, %v635_v60  ;;  %v1282_v1 = vpack.c.bf16 %v1823_v61, %v1823_v61  ;;  %v1283_v2 = vpack.c.bf16 %v1825_v62, %v1825_v62 }
 0x1b5   :  { %v638_v3 = vpack.c.bf16 %v635_v60, %v634_v59  ;;  %v639_v4 = vpack.c.bf16 %v1825_v62, %v1823_v61  ;;  %v1518_v61 = vld [vmem:[#allocation8 + $0xb8] sm:$0xff]  }
 0x1b6   :  { %v670_v5 = vshrl.u32 %v1280_v63, 16  ;;  %v678_v6 = vshrl.u32 %v1281_v0, 16  ;;  %v687_v7 = vshrl.u32 %v1282_v1, 16  ;;  %v695_v9 = vshrl.u32 %v1283_v2, 16 }
 0x1b7   :  { %v673_v12 = vshll.u32 %v1280_v63, 16  ;;  %v681_v14 = vshll.u32 %v1281_v0, 16  ;;  %v690_v17 = vshll.u32 %v1282_v1, 16  ;;  %v698_v19 = vshll.u32 %v1283_v2, 16  ;;  %v1512_v1 = vld [vmem:[#allocation8 + $0x88] sm:$0xff]  }
 0x1b8   :  { %v672_v11 = vrot.slane %v670_v5, 7  ;;  %v680_v13 = vrot.slane %v678_v6, 7  ;;  %v689_v16 = vrot.slane %v687_v7, 7  ;;  %v697_v18 = vrot.slane %v695_v9, 7  ;;  %v1514_v5 = vld [vmem:[#allocation8 + $0x98] sm:$0xff]   ;;  %v1515_v6 = vld [vmem:[#allocation8 + $0xa0] sm:$0xff]  }
 0x1b9   :  { %v1516_v7 = vld [vmem:[#allocation8 + $0xa8] sm:$0xff]  }
 0x1ba   :  { %v675_v22 = vor.u32 %v673_v12, %v672_v11  ;;  %v676_v23 = vrot.slane %v672_v11, 4  ;;  %v683_v24 = vor.u32 %v681_v14, %v680_v13  ;;  %v685_v25 = vrot.slane %v680_v13, 4 }
 0x1bb   :  { %v692_v28 = vor.u32 %v690_v17, %v689_v16  ;;  %v693_v29 = vrot.slane %v689_v16, 4  ;;  %v700_v30 = vor.u32 %v698_v19, %v697_v18  ;;  %v702_v31 = vrot.slane %v697_v18, 4 }
 0x1bc   :  { %v684_v33 = vsel %vm1834_vm13, %v676_v23, %v683_v24  ;;  %v712_v34 = vsel %vm1839_vm14, %v675_v22, %v711_v15  ;;  %v716_v36 = vsel %vm1796_vm9, %v685_v25, %v715_v21 }
 0x1bd   :  { %v701_v38 = vsel %vm1834_vm13, %v693_v29, %v700_v30  ;;  %713 = vst [vmem:[#allocation2] sm:$0xf] %v712_v34  ;;  %714 = vst [vmem:[#allocation2 + $0x4] sm:$0xf] %v684_v33  ;;  %v719_v39 = vsel %vm1839_vm14, %v692_v28, %v718_v26  ;;  %v723_v40 = vsel %vm1796_vm9, %v702_v31, %v722_v27 }
 0x1be   :  { %717 = vst [vmem:[#allocation2 + $0x8] sm:$0x1] %v716_v36  ;;  %720 = vst [vmem:[#allocation2 + $0xc] sm:$0xf] %v719_v39 }
 0x1bf   :  { %721 = vst [vmem:[#allocation2 + $0x10] sm:$0xf] %v701_v38  ;;  %724 = vst [vmem:[#allocation2 + $0x14] sm:$0x1] %v723_v40 }
 0x1c4   :  { %v1501_v45 = vld [vmem:[#allocation2] sm:$0xff]  }
 0x1c5   :  { %1390 = vmatprep.mubr.bf16.mxu1 %v1501_v45  ;;  %v969_v51 = vld [vmem:[#allocation2 + $0x4] sm:$0xf]  ;;  %v968_v55 = vld [vmem:[#allocation2] sm:$0xe]  ;;  %v970_v56 = vld [vmem:[#allocation2 + $0x8] sm:$0x1] }
 0x1c6   :  { %v1503_v46 = vld [vmem:[#allocation2 + $0xc] sm:$0xff]   ;;  %v982_v53 = vrot.slane %v969_v51, 5  ;;  %v1267_v59 = vrot.slane %v968_v55, 9  ;;  %v985_v60 = vrot.slane %v970_v56, 5  ;;  %v1148_v56 = vld [vmem:[%s1903_s6] sm:$0x1] }
 0x1c7   :  { %1391 = vmatmul.mubr.bf16.vlgmr.msra.gmra.mrb[0].mxu1 %v1503_v46  ;;  %v972_v9 = vld [vmem:[#allocation2 + $0x10] sm:$0xf]  ;;  %v971_v62 = vld [vmem:[#allocation2 + $0xc] sm:$0xe]  ;;  %s1625_s6 = smov [#allocation9]  }
 0x1c8   :  { %1395 = vmatpush3.bf16.msra.mxu1 %v1809_v54  ;;  %1410 = vmatprep.mubr.bf16.mxu1 %v638_v3  ;;  %v1510_v54 = vld [vmem:[#allocation8 + $0x78] sm:$0xff]   ;;  %v984_v57 = vrot.slane %v982_v53, 4  ;;  %v983_v0 = vsel %vm1771_vm5, %v1267_v59, %v982_v53  ;;  %v1513_v3 = vld [vmem:[#allocation8 + $0x90] sm:$0xff]   ;;  %v989_v11 = vrot.slane %v972_v9, 5  ;;  %v1268_v13 = vrot.slane %v971_v62, 9 }
 0x1c9   :  { %1396 = vmatprep.subr.bf16.mxu1 %v1504_v42 }
 0x1ca   :  { %v986_v63 = vsel %vm1771_vm5, %v984_v57, %v985_v60  ;;  %v991_v12 = vrot.slane %v989_v11, 4  ;;  %v990_v16 = vsel %vm1771_vm5, %v1268_v13, %v989_v11  ;;  %v1279_v60 = vld [vmem:[%s1904_s7] ss:$0 sm:$0xff]  ;;  %s1190_s7 = sshll.u32 %s1625_s6, 4  ;;  %s1191_s7 = int_to_ptr.vmem [resolvable:$true] %s1190_s7 }
 0x1cb   :  { %v1269_v2 = vcombine.low %v983_v0, %v986_v63  ;;  %v1243_v63 = vld [vmem:[%s1905_s8] ss:$0 sm:$0xff]  ;;  %s1589_s8 = scalar_lea.vmem %s1191_s7, 512  ;;  %p1594_p11 = scmp.lt.s32.totalorder %s1191_s7, %s1191_s7 }
 0x1cc   :  { %1397 = vmatpush3.bf16.msra.mxu1 %v1504_v42  ;;  %v577_v41 = vadd.f32 %v1243_v63, %v1793_v35  ;;  %v579_v11 = vadd.f32 %v1243_v63, %v1807_v50  ;;  %p1590_p10 = scmp.ne.s32.totalorder %s1191_s7, %s1589_s8  ;;  %p1595_p12 = scmp.lt.s32.totalorder %s1589_s8, %s1589_s8 }
 0x1cd   :  { %1398 = vmatprep.subr.bf16.mxu1 %v1505_v47 }
 0x1ce   :  { %p1596_p13 = por %p1595_p12, %p1594_p11 }
 0x1d0   :  { %1399 = vmatpush3.bf16.msra.mxu1 %v1505_v47  ;;  %p1597_p0 = pnand %p1596_p13, %p1590_p10 }
 0x1d1   :  { %1400 = vmatprep.subr.bf16.mxu1 %v1506_v48 }
 0x1d4   :  { %1401 = vmatpush3.bf16.msra.mxu1 %v1506_v48 }
 0x1d5   :  { %1402 = vmatprep.subr.bf16.mxu1 %v1507_v37 }
 0x1d8   :  { %1403 = vmatpush3.bf16.msra.mxu1 %v1507_v37 }
 0x1d9   :  { %1404 = vmatprep.subr.bf16.mxu1 %v1508_v49 }
 0x1dc   :  { %1405 = vmatpush3.bf16.msra.mxu1 %v1508_v49 }
 0x1dd   :  { %1406 = vmatprep.subr.bf16.mxu1 %v1509_v52 }
 0x1e0   :  { %1407 = vmatpush3.bf16.msra.mxu1 %v1509_v52 }
 0x1e1   :  { %1408 = vmatprep.subr.bf16.mxu1 %v1510_v54 }
 0x1e4   :  { %1409 = vmatpush3.bf16.msra.mxu1 %v1510_v54 }
 0x1e5   :  { %1414 = vmatprep.subr.bf16.mxu1 %v1511_v58 }
 0x1e7   :  { %1411 = vmatmul.mubr.bf16.vlgmr.msra.gmra.mrb[0].mxu1 %v639_v4  ;;  %v973_v4 = vld [vmem:[#allocation2 + $0x14] sm:$0x1] }
 0x1e8   :  { %1415 = vmatpush3.bf16.msra.mxu1 %v1511_v58  ;;  %1430 = vmatprep.mubr.bf16.mxu1 %v1269_v2  ;;  %v992_v14 = vrot.slane %v973_v4, 5 }
 0x1e9   :  { %1416 = vmatprep.subr.bf16.mxu1 %v1512_v1 }
 0x1ea   :  { %v993_v15 = vsel %vm1771_vm5, %v991_v12, %v992_v14 }
 0x1eb   :  { %v1270_v17 = vcombine.low %v990_v16, %v993_v15 }
 0x1ec   :  { %1417 = vmatpush3.bf16.msra.mxu1 %v1512_v1 }
 0x1ed   :  { %1418 = vmatprep.subr.bf16.mxu1 %v1513_v3 }
 0x1f0   :  { %1419 = vmatpush3.bf16.msra.mxu1 %v1513_v3 }
 0x1f1   :  { %1420 = vmatprep.subr.bf16.mxu1 %v1514_v5 }
 0x1f4   :  { %1421 = vmatpush3.bf16.msra.mxu1 %v1514_v5 }
 0x1f5   :  { %1422 = vmatprep.subr.bf16.mxu1 %v1515_v6 }
 0x1f8   :  { %1423 = vmatpush3.bf16.msra.mxu1 %v1515_v6 }
 0x1f9   :  { %1424 = vmatprep.subr.bf16.mxu1 %v1516_v7 }
 0x1fc   :  { %1425 = vmatpush3.bf16.msra.mxu1 %v1516_v7 }
 0x1fd   :  { %1426 = vmatprep.subr.bf16.mxu1 %v1517_v10 }
 0x200   :  { %1427 = vmatpush3.bf16.msra.mxu1 %v1517_v10  ;;  %v576_v10 = vadd.f32 %v1243_v63, %v1791_v32 }
 0x201   :  { %1428 = vmatprep.subr.bf16.mxu1 %v1518_v61 }
 0x204   :  { %1429 = vmatpush3.bf16.msra.mxu1 %v1518_v61 }
 0x207   :  { %1431 = vmatmul.mubr.bf16.vlgmr.msra.gmra.mrb[0].mxu1 %v1270_v17 }
 0x2da   :  { %v1432_v18 = vpop.f32.mrb[0].mxu1 }
 0x2db   :  { %v1101_v19 = vpop.f32.mrb[1].mxu1 }
 0x2dc   :  { %v1433_v20 = vpop.f32.mrb[2].mxu1 }
 0x2dd   :  { %v1104_v21 = vpop.f32.mrb[3].mxu1 }
 0x2de   :  { %v1120_v22 = vadd.f32 %v1104_v21, %v1101_v19 }
 0x2e0   :  { %v1121_v23 = vadd.f32 %v1432_v18, %v1120_v22 }
 0x2e2   :  { %v1122_v24 = vadd.f32 %v1433_v20, %v1121_v23 }
 0x2e4   :  { %v1123_v25 = vrot.slane %v1122_v24, 4 }
 0x2e6   :  { %v1124_v26 = vadd.f32 %v1123_v25, %v1122_v24 }
 0x2e8   :  { %v1125_v27 = vrot.slane %v1124_v26, 2 }
 0x2ea   :  { %v1126_v28 = vadd.f32 %v1125_v27, %v1124_v26 }
 0x2ec   :  { %v1127_v29 = vrot.slane %v1126_v28, 1 }
 0x2ee   :  { %v1128_v30 = vadd.f32 %v1127_v29, %v1126_v28 }
 0x2f0   :  { %v1129_v31 = vmul.f32 0.03125, %v1128_v30 }
 0x2f2   :  { %v1130_v33 = vsub.f32 %v1101_v19, %v1129_v31  ;;  %v1131_v34 = vsub.f32 %v1104_v21, %v1129_v31  ;;  %v1132_v8 = vsub.f32 %v1432_v18, %v1129_v31  ;;  %v1133_v36 = vsub.f32 %v1433_v20, %v1129_v31 }
 0x2f4   :  { %v1134_v38 = vmul.f32 %v1130_v33, %v1130_v33  ;;  %v1135_v39 = vmul.f32 %v1131_v34, %v1131_v34  ;;  %v1136_v40 = vmul.f32 %v1132_v8, %v1132_v8  ;;  %v1137_v45 = vmul.f32 %v1133_v36, %v1133_v36 }
 0x2f6   :  { %v1138_v42 = vadd.f32 %v1135_v39, %v1134_v38 }
 0x2f8   :  { %v1139_v46 = vadd.f32 %v1138_v42, %v1136_v40 }
 0x2fa   :  { %v1140_v47 = vadd.f32 %v1139_v46, %v1137_v45 }
 0x2fc   :  { %v1141_v48 = vrot.slane %v1140_v47, 4 }
 0x2fe   :  { %v1142_v37 = vadd.f32 %v1141_v48, %v1140_v47 }
 0x300   :  { %v1143_v49 = vrot.slane %v1142_v37, 2 }
 0x302   :  { %v1144_v51 = vadd.f32 %v1143_v49, %v1142_v37 }
 0x304   :  { %v1145_v52 = vrot.slane %v1144_v51, 1 }
 0x306   :  { %v1146_v53 = vadd.f32 %v1145_v52, %v1144_v51 }
 0x308   :  { %v1147_v54 = vmul.f32 0.03125, %v1146_v53 }
 0x30a   :  { %v1149_v55 = vadd.f32 1e-05, %v1147_v54 }
 0x30c   :  { %1521 = vrsqrt.f32 %v1149_v55 }
 0x316   :  { %v1522_v57 = vpop.eup %1521 }
 0x317   :  { %v1151_v58 = vmul.f32 %v1522_v57, %v1148_v56 }
 0x319   :  { %v1156_v59 = vrot.slane %v1151_v58, %v616_v43  ;;  %v578_v43 = vadd.f32 %v1243_v63, %v1805_v44 }
 0x31b   :  { %v1158_v0 = vmul.f32 %v1156_v59, %v1130_v33  ;;  %v1159_v1 = vmul.f32 %v1156_v59, %v1131_v34  ;;  %v1160_v2 = vmul.f32 %v1156_v59, %v1132_v8  ;;  %v1161_v3 = vmul.f32 %v1156_v59, %v1133_v36 }
 0x31d   :  { %v1169_v5 = vadd.f32 %v1279_v60, %v1158_v0  ;;  %v1170_v6 = vadd.f32 %v1279_v60, %v1159_v1  ;;  %v1171_v7 = vadd.f32 %v1279_v60, %v1160_v2  ;;  %v1172_v9 = vadd.f32 %v1279_v60, %v1161_v3 }
 0x31f   :  { %v1174_v61 = vmax.f32 %v1170_v6, 0.0  ;;  %v1173_v62 = vmax.f32 %v1169_v5, 0.0  ;;  %v1175_v4 = vmax.f32 %v1171_v7, 0.0  ;;  %v1176_v12 = vmax.f32 %v1172_v9, 0.0 }
 0x321   :  { %v1178_v13 = vadd.f32 %v1174_v61, %v577_v41  ;;  %v1177_v14 = vadd.f32 %v1173_v62, %v576_v10  ;;  %v1179_v15 = vadd.f32 %v1175_v4, %v578_v43  ;;  %v1180_v16 = vadd.f32 %v1176_v12, %v579_v11 }
 0x323   :  { %1182 = vst [vmem:[#allocation9 + $0x8] sm:$0xff] %v1178_v13  ;;  %1181 = vst [vmem:[#allocation9] sm:$0xff] %v1177_v14 }
 0x324   :  { %1183 = vst [vmem:[#allocation9 + $0x10] sm:$0xff] %v1179_v15  ;;  %1184 = vst [vmem:[#allocation9 + $0x18] sm:$0xff] %v1180_v16 }
 0x325   :  { %1600 = shalt.err (!%p1597_p0)
}
 0x326   :  { %s1601_s10 = scalar_lea.hbm %s1906_s9, 512 }
 0x327   :  { %p1602_p1 = scmp.ne.s32.totalorder %s1906_s9, %s1601_s10  ;;  %p1605_p2 = scmp.lt.u32.totalorder %s1601_s10, %s1906_s9 }
 0x329   :  { %p1607_p3 = pnand %p1605_p2, %p1602_p1 }
 0x32b   :  { %1610 = shalt.err (!%p1607_p3)
}
 0x32c   :  { %1196 = dma.vmem_to_hbm [thread:$0]  %s1191_s7, 512, %s1906_s9, [#allocation5], %s1618_s19, %s1618_s19, %s1619_s20  }
 0x32d   :  { %1615 = dma.done.wait [#allocation5], 512  }
 0x32e   :  { %1616 = vsyncadd [#allocation5], 4294966784 }
 0x32f   :  { %1200 = vsyncpa [#allocation4], 1 }
 0x330   :  { %1201 = vsyncpa [#allocation7], 1 }
 0x331   :  { %1202 = vsyncpa [#allocation5], 1 }

</bundles_post_ra>
